<compile_context>
chip_gen: v5e
topology: v5e:2x2
jax: 0.10.0
libtpu: 0.0.40
codegen_flags: <defaults>
</compile_context>

<pallas_src>
import functools
import math

import jax
import jax.numpy as jnp
from jax.experimental import pallas as pl
from jax.experimental.pallas import tpu as pltpu


def _round_up(x, m):
    return ((x + m - 1) // m) * m


def _apply_act(y, act):
    """Activation matching BaseDecoder.act_func (kept in f32)."""
    if act == "relu":
        return jnp.maximum(y, 0.0)
    if act == "tanh":
        return jnp.tanh(y)
    if act == "sigmoid":
        return jax.nn.sigmoid(y)
    if act == "leaky_relu":
        return jnp.where(y >= 0.0, y, 0.01 * y)  # nn.LeakyReLU default slope
    if act == "elu":
        # expm1 of the clamped negative part: no overflowing exp on positive lanes.
        return jnp.where(y >= 0.0, y, jnp.expm1(jnp.minimum(y, 0.0)))
    return y  # '' / identity


def _decoder_kernel(*refs, n_layers, act, act_last, mm_dtype):
    """Fused decoder stack for one row tile.

    refs layout:
      refs[0]            : x tile         (TILE_N, d_in)           param dtype
      refs[1 + 2l]       : layer-l weight (K_l_pad, P_l)           param dtype
      refs[2 + 2l]       : layer-l bias   (1, P_l)                 f32
      refs[-1]           : output tile    (TILE_N, P_last)         f32, lane-dense

    Intermediates stay live in vregs (Mosaic spills to VMEM only if needed);
    padded lanes are killed by the zero-padded K rows of the next weight.
    """
    x_ref = refs[0]
    o_ref = refs[-1]
    h = x_ref[...]
    for l in range(n_layers):  # static python loop; n_layers is tiny & static
        w = refs[1 + 2 * l][...]
        b = refs[2 + 2 * l][...]
        y = jnp.dot(h.astype(mm_dtype), w, preferred_element_type=jnp.float32)
        y = y + b.astype(jnp.float32)  # (1, P_l) broadcasts over rows
        if act_last or (l < n_layers - 1):
            y = _apply_act(y, act)
        h = y
    o_ref[...] = h.astype(o_ref.dtype)


def _param_specs(w_list, b_list, pm):
    specs = []
    for w, b in zip(w_list, b_list):
        if pm is None:
            specs.append(pl.BlockSpec(w.shape, lambda i: (0, 0)))
            specs.append(pl.BlockSpec(b.shape, lambda i: (0, 0)))
        else:
            specs.append(pl.BlockSpec(w.shape, lambda i: (0, 0), pipeline_mode=pm))
            specs.append(pl.BlockSpec(b.shape, lambda i: (0, 0), pipeline_mode=pm))
    return specs


def decoder_forward(x, w_list, b_list, *, act, act_last, out_dim, tile_n_max=1024):
    """Run the whole decoder stack as a single row-tiled pallas_call."""
    n, d_in = x.shape
    n_layers = len(w_list)
    p_last = w_list[-1].shape[1]

    dt_x = jnp.dtype(x.dtype).itemsize
    dt_w = jnp.dtype(w_list[0].dtype).itemsize
    w_bytes = sum(int(w.shape[0]) * int(w.shape[1]) * dt_w for w in w_list)
    b_bytes = sum(int(b.shape[1]) * 4 for b in b_list)
    max_w = max([d_in] + [int(w.shape[1]) for w in w_list])

    # Conservative per-tile VMEM footprint (params counted double-buffered so the
    # budget still holds if the single-buffer request is rejected and we fall back).
    def footprint(t):
        return (2 * t * d_in * dt_x            # x tiles (double-buffered)
                + 2 * t * p_last * 4           # out tiles (double-buffered)
                + 2 * (w_bytes + b_bytes)      # resident params (worst case x2)
                + 3 * t * max_w * 4)           # live activations / matmul staging

    # Chip-aware VMEM budget: ~75% of physical (64 MiB/TC on v7x, 128 MiB on v5e/v6e).
    budget = 48 << 20
    try:
        budget = int(pltpu.get_tpu_info().vmem_capacity_bytes * 3 // 4)
    except Exception:
        pass

    tile_n = min(tile_n_max, _round_up(max(n, 8), 8))
    while tile_n > 8 and footprint(tile_n) > budget:
        tile_n = max(8, _round_up(tile_n // 2, 8))

    grid = (pl.cdiv(n, tile_n),)
    vmem_limit = int(min(budget, max(16 << 20, 2 * footprint(tile_n) + (2 << 20))))

    # Advisory cost so XLA overlaps surrounding ops with the custom call.
    flops = sum(2 * n * int(w.shape[0]) * int(w.shape[1]) for w in w_list)
    trans = 0
    if act in ("tanh", "sigmoid", "elu"):
        n_act = n_layers if act_last else (n_layers - 1)
        trans = sum(n * int(w.shape[1]) for w in w_list[:n_act])
    bytes_accessed = int(x.size) * dt_x + w_bytes + b_bytes + n * p_last * 4
    cost = pl.CostEstimate(flops=int(flops), transcendentals=int(trans),
                           bytes_accessed=int(bytes_accessed))

    kernel = functools.partial(_decoder_kernel, n_layers=n_layers, act=act,
                               act_last=act_last, mm_dtype=w_list[0].dtype)

    x_spec = pl.BlockSpec((tile_n, d_in), lambda i: (i, 0))
    out_spec = pl.BlockSpec((tile_n, p_last), lambda i: (i, 0))
    cp = pltpu.CompilerParams(
        dimension_semantics=("parallel",),   # shard row tiles across TCs (v7x)
        vmem_limit_bytes=vmem_limit)

    args = [x]
    for w, b in zip(w_list, b_list):
        args += [w, b]

    def run(pm):
        fn = pl.pallas_call(
            kernel,
            out_shape=jax.ShapeDtypeStruct((n, p_last), jnp.float32),
            grid=grid,
            in_specs=[x_spec] + _param_specs(w_list, b_list, pm),
            out_specs=out_spec,
            compiler_params=cp,
            cost_estimate=cost,
        )
        return fn(*args)

    pm = pl.Buffered(1) if hasattr(pl, "Buffered") else None
    if pm is None:
        out = run(None)
    else:
        try:
            out = run(pm)           # single-buffer the constant weight/bias operands
        except Exception:
            out = run(None)         # fallback: default double-buffering

    # Lane-dense (p_last-wide) HBM writeback inside the kernel; slice here.
    return out[:, :out_dim]


class BaseDecoderPallas:
    """Mirror of BaseDecoder(dims, layer='linear', act=..., act_last=...)."""

    def __init__(self, dims, layer="linear", act="relu", act_last=False,
                 param_dtype=jnp.float32, key=None):
        if not dims:
            raise ValueError("dims cannot be None and should be a list of dimensions")
        if len(dims) < 2:
            raise ValueError("dims must contain at least input and output dimensions")
        if layer != "linear":
            # TODO(synk): graph layers ('gcn','gat','sage','sg') need adjacency
            # message passing; only the 'linear' stack is implemented in Pallas.
            raise NotImplementedError("only layer='linear' is implemented")
        self.act = act
        self.act_last = act_last
        self.param_dtype = jnp.dtype(param_dtype)

        rev = dims[::-1]  # decoder reverses the dim list, as in the PyTorch module
        self.layer_dims = [(rev[i], rev[i + 1]) for i in range(len(rev) - 1)]
        self.out_dim = rev[-1]

        # Deterministic init mimicking nn.Linear.reset_parameters():
        # W, b ~ U(-1/sqrt(in), 1/sqrt(in)).
        if key is None:
            key = jax.random.PRNGKey(0)
        self.params = []                 # unpadded f32 params, for the reference
        self.w_list, self.b_list = [], []
        for li, (d_in, d_out) in enumerate(self.layer_dims):
            key, kw, kb = jax.random.split(key, 3)
            bound = 1.0 / math.sqrt(d_in)
            w = jax.random.uniform(kw, (d_in, d_out), jnp.float32, -bound, bound)
            b = jax.random.uniform(kb, (d_out,), jnp.float32, -bound, bound)
            self.params.append((w, b))
            # Layer 0 keeps the real input width (x is not feature-padded);
            # deeper layers pad K to the previous layer's 128-aligned width.
            p_in = d_in if li == 0 else _round_up(d_in, 128)
            p_out = _round_up(d_out, 128)
            w_pad = jnp.pad(w, ((0, p_in - d_in), (0, p_out - d_out)))
            self.w_list.append(w_pad.astype(self.param_dtype))
            self.b_list.append(jnp.pad(b, (0, p_out - d_out))[None, :])  # f32

    def __call__(self, x):
        x = x.astype(self.param_dtype)
        return decoder_forward(x, self.w_list, self.b_list,
                               act=self.act, act_last=self.act_last,
                               out_dim=self.out_dim)

    def reference(self, x):
        """Pure-JAX reference using the SAME dtype/precision path as the kernel."""
        n_layers = len(self.params)
        h = x.astype(self.param_dtype)
        for i, (w, b) in enumerate(self.params):
            h = jnp.dot(h.astype(self.param_dtype), w.astype(self.param_dtype),
                        preferred_element_type=jnp.float32) + b.astype(jnp.float32)
            if self.act_last or (i < n_layers - 1):
                h = _apply_act(h, self.act)
        return h


if __name__ == "__main__":
    # Config 1: dims listed "input -> output" of the autoencoder; decoder runs
    # them reversed: 8 -> 16 (ReLU) -> 32 (no act, act_last=False).
    dims = [32, 16, 8]
    dec = BaseDecoderPallas(dims, act="relu", act_last=False,
                            key=jax.random.PRNGKey(1))
    x = jax.random.normal(jax.random.PRNGKey(0), (10, dims[-1]), jnp.float32)
    out = jax.block_until_ready(dec(x))
    ref = dec.reference(x)
    assert out.shape == (10, dims[0])
    assert jnp.allclose(out, ref, atol=2e-4, rtol=2e-4), "relu decoder mismatch"

    # Config 2: non-ReLU activation and act_last=True.
    dims2 = [64, 16]
    dec2 = BaseDecoderPallas(dims2, act="elu", act_last=True,
                             key=jax.random.PRNGKey(2))
    x2 = jax.random.normal(jax.random.PRNGKey(3), (8, dims2[-1]), jnp.float32)
    out2 = jax.block_until_ready(dec2(x2))
    ref2 = dec2.reference(x2)
    assert out2.shape == (8, dims2[0])
    assert jnp.allclose(out2, ref2, atol=2e-4, rtol=2e-4), "elu decoder mismatch"

    # Config 3: bf16 parameter / matmul storage (mem-bound win on v6e/v7x);
    # bias add + activation + accumulation stay f32.
    dims3 = [128, 64]
    dec3 = BaseDecoderPallas(dims3, act="relu", act_last=False,
                             param_dtype=jnp.bfloat16, key=jax.random.PRNGKey(4))
    x3 = jax.random.normal(jax.random.PRNGKey(5), (16, dims3[-1]), jnp.float32)
    out3 = jax.block_until_ready(dec3(x3))
    ref3 = dec3.reference(x3)
    assert out3.shape == (16, dims3[0])
    assert jnp.allclose(out3, ref3, atol=2e-2, rtol=2e-2), "bf16 decoder mismatch"

    print("KERNEL_OK")
</pallas_src>

<mosaic_0001>
module attributes {stable_mosaic.version = 11 : i64} {
  func.func @_decoder_kernel(%arg0: i32, %arg1: memref<16x8xf32, #tpu.memory_space<vmem>>, %arg2: memref<8x128xf32, #tpu.memory_space<vmem>>, %arg3: memref<1x128xf32, #tpu.memory_space<vmem>>, %arg4: memref<128x128xf32, #tpu.memory_space<vmem>>, %arg5: memref<1x128xf32, #tpu.memory_space<vmem>>, %arg6: memref<16x128xf32, #tpu.memory_space<vmem>>) attributes {dimension_semantics = [#tpu.dimension_semantics<parallel>], iteration_bounds = array<i64: 1>, scalar_prefetch = 0 : i64, scratch_operands = 0 : i64, tpu.core_type = #tpu.core_type<tc>, window_params = [{transform_indices = @transform_0, window_bounds = array<i64: 16, 8>}, {pipeline_mode = #tpu.pipeline_mode<synchronous>, transform_indices = @transform_1, window_bounds = array<i64: 8, 128>}, {pipeline_mode = #tpu.pipeline_mode<synchronous>, transform_indices = @transform_2, window_bounds = array<i64: 1, 128>}, {pipeline_mode = #tpu.pipeline_mode<synchronous>, transform_indices = @transform_3, window_bounds = array<i64: 128, 128>}, {pipeline_mode = #tpu.pipeline_mode<synchronous>, transform_indices = @transform_4, window_bounds = array<i64: 1, 128>}, {transform_indices = @transform_5, window_bounds = array<i64: 16, 128>}]} {
    %c0 = arith.constant 0 : index
    %c0_0 = arith.constant 0 : index
    %0 = vector.load %arg1[%c0, %c0_0] : memref<16x8xf32, #tpu.memory_space<vmem>>, vector<16x8xf32>
    %c0_1 = arith.constant 0 : index
    %c0_2 = arith.constant 0 : index
    %1 = vector.load %arg2[%c0_1, %c0_2] : memref<8x128xf32, #tpu.memory_space<vmem>>, vector<8x128xf32>
    %c0_3 = arith.constant 0 : index
    %c0_4 = arith.constant 0 : index
    %2 = vector.load %arg3[%c0_3, %c0_4] : memref<1x128xf32, #tpu.memory_space<vmem>>, vector<1x128xf32>
    %cst = arith.constant dense<0.000000e+00> : vector<16x128xf32>
    %3 = tpu.matmul %0, %1, %cst {dimension_numbers = #tpu.dot_dimension_numbers<[1], [0], [0], [1], [0, 0, 1, 1], [], []>} : vector<16x8xf32>, vector<8x128xf32>, vector<16x128xf32> -> vector<16x128xf32>
    %4 = vector.broadcast %2 : vector<1x128xf32> to vector<16x128xf32>
    %5 = arith.addf %3, %4 : vector<16x128xf32>
    %cst_5 = arith.constant 0.000000e+00 : f32
    %6 = vector.broadcast %cst_5 : f32 to vector<16x128xf32>
    %7 = arith.maximumf %5, %6 : vector<16x128xf32>
    %c0_6 = arith.constant 0 : index
    %c0_7 = arith.constant 0 : index
    %8 = vector.load %arg4[%c0_6, %c0_7] : memref<128x128xf32, #tpu.memory_space<vmem>>, vector<128x128xf32>
    %c0_8 = arith.constant 0 : index
    %c0_9 = arith.constant 0 : index
    %9 = vector.load %arg5[%c0_8, %c0_9] : memref<1x128xf32, #tpu.memory_space<vmem>>, vector<1x128xf32>
    %cst_10 = arith.constant dense<0.000000e+00> : vector<16x128xf32>
    %10 = tpu.matmul %7, %8, %cst_10 {dimension_numbers = #tpu.dot_dimension_numbers<[1], [0], [0], [1], [0, 0, 1, 1], [], []>} : vector<16x128xf32>, vector<128x128xf32>, vector<16x128xf32> -> vector<16x128xf32>
    %11 = vector.broadcast %9 : vector<1x128xf32> to vector<16x128xf32>
    %12 = arith.addf %10, %11 : vector<16x128xf32>
    %c0_11 = arith.constant 0 : index
    %c0_12 = arith.constant 0 : index
    %13 = vector.load %arg6[%c0_11, %c0_12] : memref<16x128xf32, #tpu.memory_space<vmem>>, vector<16x128xf32>
    tpu.vector_store %arg6[%c0_11, %c0_12], %12 {strides = array<i32>} : memref<16x128xf32, #tpu.memory_space<vmem>>, vector<16x128xf32>,
    return
  }
  func.func @transform_0(%arg0: i32) -> (i32, i32) {
    %c0_i32 = arith.constant 0 : i32
    %c0_i32_0 = arith.constant 0 : i32
    return %arg0, %c0_i32 : i32, i32
  }
  func.func @transform_1(%arg0: i32) -> (i32, i32) {
    %c0_i32 = arith.constant 0 : i32
    %c0_i32_0 = arith.constant 0 : i32
    %c0_i32_1 = arith.constant 0 : i32
    return %c0_i32, %c0_i32_0 : i32, i32
  }
  func.func @transform_2(%arg0: i32) -> (i32, i32) {
    %c0_i32 = arith.constant 0 : i32
    %c0_i32_0 = arith.constant 0 : i32
    %c0_i32_1 = arith.constant 0 : i32
    return %c0_i32, %c0_i32_0 : i32, i32
  }
  func.func @transform_3(%arg0: i32) -> (i32, i32) {
    %c0_i32 = arith.constant 0 : i32
    %c0_i32_0 = arith.constant 0 : i32
    %c0_i32_1 = arith.constant 0 : i32
    return %c0_i32, %c0_i32_0 : i32, i32
  }
  func.func @transform_4(%arg0: i32) -> (i32, i32) {
    %c0_i32 = arith.constant 0 : i32
    %c0_i32_0 = arith.constant 0 : i32
    %c0_i32_1 = arith.constant 0 : i32
    return %c0_i32, %c0_i32_0 : i32, i32
  }
  func.func @transform_5(%arg0: i32) -> (i32, i32) {
    %c0_i32 = arith.constant 0 : i32
    %c0_i32_0 = arith.constant 0 : i32
    return %arg0, %c0_i32 : i32, i32
  }
}

module attributes {stable_mosaic.version = 11 : i64} {
  func.func @_decoder_kernel(%arg0: i32, %arg1: memref<16x8xf32, #tpu.memory_space<vmem>>, %arg2: memref<8x128xf32, #tpu.memory_space<vmem>>, %arg3: memref<1x128xf32, #tpu.memory_space<vmem>>, %arg4: memref<128x128xf32, #tpu.memory_space<vmem>>, %arg5: memref<1x128xf32, #tpu.memory_space<vmem>>, %arg6: memref<16x128xf32, #tpu.memory_space<vmem>>) attributes {dimension_semantics = [#tpu.dimension_semantics<parallel>], iteration_bounds = array<i64: 1>, scalar_prefetch = 0 : i64, scratch_operands = 0 : i64, tpu.core_type = #tpu.core_type<tc>, window_params = [{transform_indices = @transform_0, window_bounds = array<i64: 16, 8>}, {pipeline_mode = #tpu.pipeline_mode<synchronous>, transform_indices = @transform_1, window_bounds = array<i64: 8, 128>}, {pipeline_mode = #tpu.pipeline_mode<synchronous>, transform_indices = @transform_2, window_bounds = array<i64: 1, 128>}, {pipeline_mode = #tpu.pipeline_mode<synchronous>, transform_indices = @transform_3, window_bounds = array<i64: 128, 128>}, {pipeline_mode = #tpu.pipeline_mode<synchronous>, transform_indices = @transform_4, window_bounds = array<i64: 1, 128>}, {transform_indices = @transform_5, window_bounds = array<i64: 16, 128>}]} {
    %c0 = arith.constant 0 : index
    %c0_0 = arith.constant 0 : index
    %0 = vector.load %arg1[%c0, %c0_0] : memref<16x8xf32, #tpu.memory_space<vmem>>, vector<16x8xf32>
    %c0_1 = arith.constant 0 : index
    %c0_2 = arith.constant 0 : index
    %1 = vector.load %arg2[%c0_1, %c0_2] : memref<8x128xf32, #tpu.memory_space<vmem>>, vector<8x128xf32>
    %c0_3 = arith.constant 0 : index
    %c0_4 = arith.constant 0 : index
    %2 = vector.load %arg3[%c0_3, %c0_4] : memref<1x128xf32, #tpu.memory_space<vmem>>, vector<1x128xf32>
    %cst = arith.constant dense<0.000000e+00> : vector<16x128xf32>
    %3 = tpu.matmul %0, %1, %cst {dimension_numbers = #tpu.dot_dimension_numbers<[1], [0], [0], [1], [0, 0, 1, 1], [], []>} : vector<16x8xf32>, vector<8x128xf32>, vector<16x128xf32> -> vector<16x128xf32>
    %4 = vector.broadcast %2 : vector<1x128xf32> to vector<16x128xf32>
    %5 = arith.addf %3, %4 : vector<16x128xf32>
    %cst_5 = arith.constant 0.000000e+00 : f32
    %6 = vector.broadcast %cst_5 : f32 to vector<16x128xf32>
    %7 = arith.maximumf %5, %6 : vector<16x128xf32>
    %c0_6 = arith.constant 0 : index
    %c0_7 = arith.constant 0 : index
    %8 = vector.load %arg4[%c0_6, %c0_7] : memref<128x128xf32, #tpu.memory_space<vmem>>, vector<128x128xf32>
    %c0_8 = arith.constant 0 : index
    %c0_9 = arith.constant 0 : index
    %9 = vector.load %arg5[%c0_8, %c0_9] : memref<1x128xf32, #tpu.memory_space<vmem>>, vector<1x128xf32>
    %cst_10 = arith.constant dense<0.000000e+00> : vector<16x128xf32>
    %10 = tpu.matmul %7, %8, %cst_10 {dimension_numbers = #tpu.dot_dimension_numbers<[1], [0], [0], [1], [0, 0, 1, 1], [], []>} : vector<16x128xf32>, vector<128x128xf32>, vector<16x128xf32> -> vector<16x128xf32>
    %11 = vector.broadcast %9 : vector<1x128xf32> to vector<16x128xf32>
    %12 = arith.addf %10, %11 : vector<16x128xf32>
    %c0_11 = arith.constant 0 : index
    %c0_12 = arith.constant 0 : index
    %13 = vector.load %arg6[%c0_11, %c0_12] : memref<16x128xf32, #tpu.memory_space<vmem>>, vector<16x128xf32>
    tpu.vector_store %arg6[%c0_11, %c0_12], %12 {strides = array<i32>} : memref<16x128xf32, #tpu.memory_space<vmem>>, vector<16x128xf32>,
    return
  }
  func.func @transform_0(%arg0: i32) -> (i32, i32) {
    %c0_i32 = arith.constant 0 : i32
    %c0_i32_0 = arith.constant 0 : i32
    return %arg0, %c0_i32 : i32, i32
  }
  func.func @transform_1(%arg0: i32) -> (i32, i32) {
    %c0_i32 = arith.constant 0 : i32
    %c0_i32_0 = arith.constant 0 : i32
    %c0_i32_1 = arith.constant 0 : i32
    return %c0_i32, %c0_i32_0 : i32, i32
  }
  func.func @transform_2(%arg0: i32) -> (i32, i32) {
    %c0_i32 = arith.constant 0 : i32
    %c0_i32_0 = arith.constant 0 : i32
    %c0_i32_1 = arith.constant 0 : i32
    return %c0_i32, %c0_i32_0 : i32, i32
  }
  func.func @transform_3(%arg0: i32) -> (i32, i32) {
    %c0_i32 = arith.constant 0 : i32
    %c0_i32_0 = arith.constant 0 : i32
    %c0_i32_1 = arith.constant 0 : i32
    return %c0_i32, %c0_i32_0 : i32, i32
  }
  func.func @transform_4(%arg0: i32) -> (i32, i32) {
    %c0_i32 = arith.constant 0 : i32
    %c0_i32_0 = arith.constant 0 : i32
    %c0_i32_1 = arith.constant 0 : i32
    return %c0_i32, %c0_i32_0 : i32, i32
  }
  func.func @transform_5(%arg0: i32) -> (i32, i32) {
    %c0_i32 = arith.constant 0 : i32
    %c0_i32_0 = arith.constant 0 : i32
    return %arg0, %c0_i32 : i32, i32
  }
}

</mosaic_0001>

<bundles_post_ra>
// kernel: tpu_custom_call.1
= control target key start
LH: loop header
LB: loop body
LE: loop exit
PB: predicated region body
PF: predicated region fallthrough
CT: control target
= control target key end

     0   :  { %10 = vsyncpa [#allocation3], 0  ;;  %s279_s0 = inlined_call_operand.vmem [shape: f32[10,8], index: 0, kind: input, shape index: {}]   ;;  %s280_s1 = inlined_call_operand.vmem [shape: f32[8,128], index: 1, kind: input, shape index: {}]   ;;  %s281_s2 = inlined_call_operand.vmem [shape: f32[1,128], index: 2, kind: input, shape index: {}]   ;;  %s282_s3 = inlined_call_operand.hbm [shape: f32[128,128], index: 3, kind: input, shape index: {}]   ;;  %s283_s4 = inlined_call_operand.vmem [shape: f32[1,128], index: 4, kind: input, shape index: {}]   ;;  %s284_s5 = inlined_call_operand.hbm [shape: f32[10,128], index: 5, kind: output, shape index: {}]  }
   0x1   :  { %11 = vsyncpa [#allocation4], 0  ;;  %s22_s20 = sshll.u32 %s282_s3, 4  ;;  %s216_s21 = smov [#allocation2]   ;;  %s23_s20 = int_to_ptr.hbm [resolvable:$true] %s22_s20 }
   0x2   :  { %s24_s22 = sshll.u32 %s216_s21, 4  ;;  %s217_s23 = smov 128   ;;  %s25_s22 = int_to_ptr.vmem [resolvable:$true] %s24_s22 }
   0x3   :  { %s218_s24 = smov 8  }
   0x4   :  { %30 = dma.hbm_to_vmem [thread:$0]  %s23_s20, 2048, %s25_s22, [#allocation3], %s217_s23, %s217_s23, %s218_s24  }
   0x5   :  { %212 = dma.done.wait [#allocation3], 2048  }
   0x6   :  { %213 = vsyncadd [#allocation3], 4294965248  ;;  %vm44_vm0 = vcmask 64512   ;;  %v39_v0 = vld [vmem:[%s280_s1] sm:$0xff]  ;;  %v91_v2 = vld [vmem:[#allocation2 + $0x78] sm:$0xff]  ;;  %s219_s7 = smov [#allocation5]  }
   0x7   :  { %v37_v1 = vld [vmem:[%s279_s0] sm:$0xff]  ;;  %66 = vmatpush.msra.mxu0 %v39_v0  ;;  %v90_v3 = vld [vmem:[#allocation2 + $0x70] sm:$0xff]  ;;  %96 = vmatpush.msra.mxu1 %v91_v2  ;;  %v89_v4 = vld [vmem:[#allocation2 + $0x68] sm:$0xff]  ;;  %s125_s8 = sshll.u32 %s219_s7, 4  ;;  %s126_s8 = int_to_ptr.vmem [resolvable:$true] %s125_s8 }
   0x8   :  { %140 = vmatmul.msk.f32.vlgmr.msra.gmra.mxu0 %vm44_vm0, %v37_v1  ;;  %142 = vmatpush.msra.mxu2 %v91_v2  ;;  %v88_v5 = vld [vmem:[#allocation2 + $0x60] sm:$0xff]  ;;  %v38_v6 = vld [vmem:[%s279_s0 + $0x8] sm:$0xff]  ;;  %v87_v7 = vld [vmem:[#allocation2 + $0x58] sm:$0xff] }
   0x9   :  { %97 = vmatpush.msra.mxu1 %v90_v3  ;;  %v86_v8 = vld [vmem:[#allocation2 + $0x50] sm:$0xff]  ;;  %v85_v9 = vld [vmem:[#allocation2 + $0x48] sm:$0xff]  ;;  %v84_v10 = vld [vmem:[#allocation2 + $0x40] sm:$0xff] }
   0xa   :  { %143 = vmatpush.msra.mxu2 %v90_v3  ;;  %v83_v11 = vld [vmem:[#allocation2 + $0x38] sm:$0xff]  ;;  %v82_v12 = vld [vmem:[#allocation2 + $0x30] sm:$0xff]  ;;  %v81_v13 = vld [vmem:[#allocation2 + $0x28] sm:$0xff] }
   0xb   :  { %98 = vmatpush.msra.mxu1 %v89_v4  ;;  %v80_v14 = vld [vmem:[#allocation2 + $0x20] sm:$0xff]  ;;  %v79_v15 = vld [vmem:[#allocation2 + $0x18] sm:$0xff]  ;;  %v78_v16 = vld [vmem:[#allocation2 + $0x10] sm:$0xff] }
   0xc   :  { %144 = vmatpush.msra.mxu2 %v89_v4  ;;  %v77_v17 = vld [vmem:[#allocation2 + $0x8] sm:$0xff]  ;;  %v76_v18 = vld [vmem:[#allocation2] sm:$0xff] }
   0xd   :  { %99 = vmatpush.msra.mxu1 %v88_v5  ;;  %v162_v19 = vld [vmem:[%s281_s2] ss:$0 sm:$0xff]  ;;  %s127_s2 = sshll.u32 %s284_s5, 4  ;;  %s128_s2 = int_to_ptr.hbm [resolvable:$true] %s127_s2 }
   0xe   :  { %145 = vmatpush.msra.mxu2 %v88_v5  ;;  %v163_v26 = vld [vmem:[%s283_s4] ss:$0 sm:$0xff] }
   0xf   :  { %100 = vmatpush.msra.mxu1 %v87_v7 }
  0x10   :  { %141 = vmatmul.msk.f32.gmra.mxu0 %vm44_vm0, %v38_v6  ;;  %146 = vmatpush.msra.mxu2 %v87_v7 }
  0x11   :  { %101 = vmatpush.msra.mxu1 %v86_v8 }
  0x12   :  { %147 = vmatpush.msra.mxu2 %v86_v8 }
  0x13   :  { %102 = vmatpush.msra.mxu1 %v85_v9 }
  0x14   :  { %148 = vmatpush.msra.mxu2 %v85_v9 }
  0x15   :  { %103 = vmatpush.msra.mxu1 %v84_v10 }
  0x16   :  { %149 = vmatpush.msra.mxu2 %v84_v10 }
  0x17   :  { %104 = vmatpush.msra.mxu1 %v83_v11 }
  0x18   :  { %150 = vmatpush.msra.mxu2 %v83_v11 }
  0x19   :  { %105 = vmatpush.msra.mxu1 %v82_v12 }
  0x1a   :  { %151 = vmatpush.msra.mxu2 %v82_v12 }
  0x1b   :  { %106 = vmatpush.msra.mxu1 %v81_v13 }
  0x1c   :  { %152 = vmatpush.msra.mxu2 %v81_v13 }
  0x1d   :  { %107 = vmatpush.msra.mxu1 %v80_v14 }
  0x1e   :  { %153 = vmatpush.msra.mxu2 %v80_v14 }
  0x1f   :  { %108 = vmatpush.msra.mxu1 %v79_v15 }
  0x20   :  { %154 = vmatpush.msra.mxu2 %v79_v15 }
  0x21   :  { %109 = vmatpush.msra.mxu1 %v78_v16 }
  0x22   :  { %155 = vmatpush.msra.mxu2 %v78_v16 }
  0x23   :  { %110 = vmatpush.msra.mxu1 %v77_v17 }
  0x24   :  { %156 = vmatpush.msra.mxu2 %v77_v17 }
  0x25   :  { %111 = vmatpush.msra.mxu1 %v76_v18 }
  0x26   :  { %157 = vmatpush.msra.mxu2 %v76_v18 }
  0x85   :  { %v68_v20 = vpop.f32.mrf.mxu0 }
  0x86   :  { %v69_v21 = vadd.f32 %v162_v19, %v68_v20 }
  0x88   :  { %v74_v22 = vmax.f32 %v69_v21, 0.0 }
  0x8a   :  { %112 = vmatmul.f32.vlgmr.msra.gmra.mxu1 %v74_v22 }
  0x8d   :  { %v71_v23 = vpop.f32.mrf.mxu0 }
  0x8e   :  { %v72_v24 = vadd.f32 %v162_v19, %v71_v23 }
  0x90   :  { %v75_v25 = vmax.f32 %v72_v24, 0.0 }
  0x92   :  { %115 = vmatmul.f32.vlgmr.msra.gmra.mxu2 %v75_v25 }
 0x107   :  { %v113_v27 = vpop.f32.mrf.mxu1 }
 0x108   :  { %v114_v28 = vadd.f32 %v163_v26, %v113_v27 }
 0x10a   :  { %119 = vst [vmem:[#allocation5] sm:$0xff] %v114_v28 }
 0x115   :  { %v116_v29 = vpop.f32.mrf.mxu2 }
 0x116   :  { %v117_v30 = vadd.f32 %v163_v26, %v116_v29 }
 0x118   :  { %120 = vst [vmem:[#allocation5 + $0x8] sm:$0xff] %v117_v30 }
 0x119   :  { %133 = dma.vmem_to_hbm [thread:$0]  %s126_s8, 256, %s128_s2, [#allocation4], %s217_s23, %s217_s23, %s218_s24  }
 0x11a   :  { %214 = dma.done.wait [#allocation4], 256  }
 0x11b   :  { %215 = vsyncadd [#allocation4], 4294967040 }
 0x11c   :  { %138 = vsyncpa [#allocation3], 1 }
 0x11d   :  { %139 = vsyncpa [#allocation4], 1 }

// kernel: tpu_custom_call.1
= control target key start
LH: loop header
LB: loop body
LE: loop exit
PB: predicated region body
PF: predicated region fallthrough
CT: control target
= control target key end

     0   :  { %10 = vsyncpa [#allocation3], 0  ;;  %s279_s0 = inlined_call_operand.vmem [shape: f32[10,8], index: 0, kind: input, shape index: {}]   ;;  %s280_s1 = inlined_call_operand.vmem [shape: f32[8,128], index: 1, kind: input, shape index: {}]   ;;  %s281_s2 = inlined_call_operand.vmem [shape: f32[1,128], index: 2, kind: input, shape index: {}]   ;;  %s282_s3 = inlined_call_operand.hbm [shape: f32[128,128], index: 3, kind: input, shape index: {}]   ;;  %s283_s4 = inlined_call_operand.vmem [shape: f32[1,128], index: 4, kind: input, shape index: {}]   ;;  %s284_s5 = inlined_call_operand.hbm [shape: f32[10,128], index: 5, kind: output, shape index: {}]  }
   0x1   :  { %11 = vsyncpa [#allocation4], 0  ;;  %s22_s20 = sshll.u32 %s282_s3, 4  ;;  %s216_s21 = smov [#allocation2]   ;;  %s23_s20 = int_to_ptr.hbm [resolvable:$true] %s22_s20 }
   0x2   :  { %s24_s22 = sshll.u32 %s216_s21, 4  ;;  %s217_s23 = smov 128   ;;  %s25_s22 = int_to_ptr.vmem [resolvable:$true] %s24_s22 }
   0x3   :  { %s218_s24 = smov 8  }
   0x4   :  { %30 = dma.hbm_to_vmem [thread:$0]  %s23_s20, 2048, %s25_s22, [#allocation3], %s217_s23, %s217_s23, %s218_s24  }
   0x5   :  { %212 = dma.done.wait [#allocation3], 2048  }
   0x6   :  { %213 = vsyncadd [#allocation3], 4294965248  ;;  %vm44_vm0 = vcmask 64512   ;;  %v39_v0 = vld [vmem:[%s280_s1] sm:$0xff]  ;;  %v91_v2 = vld [vmem:[#allocation2 + $0x78] sm:$0xff]  ;;  %s219_s7 = smov [#allocation5]  }
   0x7   :  { %v37_v1 = vld [vmem:[%s279_s0] sm:$0xff]  ;;  %66 = vmatpush.msra.mxu0 %v39_v0  ;;  %v90_v3 = vld [vmem:[#allocation2 + $0x70] sm:$0xff]  ;;  %96 = vmatpush.msra.mxu1 %v91_v2  ;;  %v89_v4 = vld [vmem:[#allocation2 + $0x68] sm:$0xff]  ;;  %s125_s8 = sshll.u32 %s219_s7, 4  ;;  %s126_s8 = int_to_ptr.vmem [resolvable:$true] %s125_s8 }
   0x8   :  { %140 = vmatmul.msk.f32.vlgmr.msra.gmra.mxu0 %vm44_vm0, %v37_v1  ;;  %142 = vmatpush.msra.mxu2 %v91_v2  ;;  %v88_v5 = vld [vmem:[#allocation2 + $0x60] sm:$0xff]  ;;  %v38_v6 = vld [vmem:[%s279_s0 + $0x8] sm:$0xff]  ;;  %v87_v7 = vld [vmem:[#allocation2 + $0x58] sm:$0xff] }
   0x9   :  { %97 = vmatpush.msra.mxu1 %v90_v3  ;;  %v86_v8 = vld [vmem:[#allocation2 + $0x50] sm:$0xff]  ;;  %v85_v9 = vld [vmem:[#allocation2 + $0x48] sm:$0xff]  ;;  %v84_v10 = vld [vmem:[#allocation2 + $0x40] sm:$0xff] }
   0xa   :  { %143 = vmatpush.msra.mxu2 %v90_v3  ;;  %v83_v11 = vld [vmem:[#allocation2 + $0x38] sm:$0xff]  ;;  %v82_v12 = vld [vmem:[#allocation2 + $0x30] sm:$0xff]  ;;  %v81_v13 = vld [vmem:[#allocation2 + $0x28] sm:$0xff] }
   0xb   :  { %98 = vmatpush.msra.mxu1 %v89_v4  ;;  %v80_v14 = vld [vmem:[#allocation2 + $0x20] sm:$0xff]  ;;  %v79_v15 = vld [vmem:[#allocation2 + $0x18] sm:$0xff]  ;;  %v78_v16 = vld [vmem:[#allocation2 + $0x10] sm:$0xff] }
   0xc   :  { %144 = vmatpush.msra.mxu2 %v89_v4  ;;  %v77_v17 = vld [vmem:[#allocation2 + $0x8] sm:$0xff]  ;;  %v76_v18 = vld [vmem:[#allocation2] sm:$0xff] }
   0xd   :  { %99 = vmatpush.msra.mxu1 %v88_v5  ;;  %v162_v19 = vld [vmem:[%s281_s2] ss:$0 sm:$0xff]  ;;  %s127_s2 = sshll.u32 %s284_s5, 4  ;;  %s128_s2 = int_to_ptr.hbm [resolvable:$true] %s127_s2 }
   0xe   :  { %145 = vmatpush.msra.mxu2 %v88_v5  ;;  %v163_v26 = vld [vmem:[%s283_s4] ss:$0 sm:$0xff] }
   0xf   :  { %100 = vmatpush.msra.mxu1 %v87_v7 }
  0x10   :  { %141 = vmatmul.msk.f32.gmra.mxu0 %vm44_vm0, %v38_v6  ;;  %146 = vmatpush.msra.mxu2 %v87_v7 }
  0x11   :  { %101 = vmatpush.msra.mxu1 %v86_v8 }
  0x12   :  { %147 = vmatpush.msra.mxu2 %v86_v8 }
  0x13   :  { %102 = vmatpush.msra.mxu1 %v85_v9 }
  0x14   :  { %148 = vmatpush.msra.mxu2 %v85_v9 }
  0x15   :  { %103 = vmatpush.msra.mxu1 %v84_v10 }
  0x16   :  { %149 = vmatpush.msra.mxu2 %v84_v10 }
  0x17   :  { %104 = vmatpush.msra.mxu1 %v83_v11 }
  0x18   :  { %150 = vmatpush.msra.mxu2 %v83_v11 }
  0x19   :  { %105 = vmatpush.msra.mxu1 %v82_v12 }
  0x1a   :  { %151 = vmatpush.msra.mxu2 %v82_v12 }
  0x1b   :  { %106 = vmatpush.msra.mxu1 %v81_v13 }
  0x1c   :  { %152 = vmatpush.msra.mxu2 %v81_v13 }
  0x1d   :  { %107 = vmatpush.msra.mxu1 %v80_v14 }
  0x1e   :  { %153 = vmatpush.msra.mxu2 %v80_v14 }
  0x1f   :  { %108 = vmatpush.msra.mxu1 %v79_v15 }
  0x20   :  { %154 = vmatpush.msra.mxu2 %v79_v15 }
  0x21   :  { %109 = vmatpush.msra.mxu1 %v78_v16 }
  0x22   :  { %155 = vmatpush.msra.mxu2 %v78_v16 }
  0x23   :  { %110 = vmatpush.msra.mxu1 %v77_v17 }
  0x24   :  { %156 = vmatpush.msra.mxu2 %v77_v17 }
  0x25   :  { %111 = vmatpush.msra.mxu1 %v76_v18 }
  0x26   :  { %157 = vmatpush.msra.mxu2 %v76_v18 }
  0x85   :  { %v68_v20 = vpop.f32.mrf.mxu0 }
  0x86   :  { %v69_v21 = vadd.f32 %v162_v19, %v68_v20 }
  0x88   :  { %v74_v22 = vmax.f32 %v69_v21, 0.0 }
  0x8a   :  { %112 = vmatmul.f32.vlgmr.msra.gmra.mxu1 %v74_v22 }
  0x8d   :  { %v71_v23 = vpop.f32.mrf.mxu0 }
  0x8e   :  { %v72_v24 = vadd.f32 %v162_v19, %v71_v23 }
  0x90   :  { %v75_v25 = vmax.f32 %v72_v24, 0.0 }
  0x92   :  { %115 = vmatmul.f32.vlgmr.msra.gmra.mxu2 %v75_v25 }
 0x107   :  { %v113_v27 = vpop.f32.mrf.mxu1 }
 0x108   :  { %v114_v28 = vadd.f32 %v163_v26, %v113_v27 }
 0x10a   :  { %119 = vst [vmem:[#allocation5] sm:$0xff] %v114_v28 }
 0x115   :  { %v116_v29 = vpop.f32.mrf.mxu2 }
 0x116   :  { %v117_v30 = vadd.f32 %v163_v26, %v116_v29 }
 0x118   :  { %120 = vst [vmem:[#allocation5 + $0x8] sm:$0xff] %v117_v30 }
 0x119   :  { %133 = dma.vmem_to_hbm [thread:$0]  %s126_s8, 256, %s128_s2, [#allocation4], %s217_s23, %s217_s23, %s218_s24  }
 0x11a   :  { %214 = dma.done.wait [#allocation4], 256  }
 0x11b   :  { %215 = vsyncadd [#allocation4], 4294967040 }
 0x11c   :  { %138 = vsyncpa [#allocation3], 1 }
 0x11d   :  { %139 = vsyncpa [#allocation4], 1 }

</bundles_post_ra>
